<compile_context>
chip_gen: v5e
topology: v5e:2x2
jax: 0.10.0
libtpu: 0.0.40
codegen_flags: <defaults>
</compile_context>

<pallas_src>
import jax
import jax.numpy as jnp
from jax.experimental import pallas as pl
from jax.experimental.pallas import tpu as pltpu


def _mask_attention_kernel(w_ref, x_ref, m_ref, out_ref, sc_ref):
    # w_ref  : (1, D)        attention_layer.weight (Linear(D, 1, bias=False))
    # x_ref  : (TB, L, D)    block of TILE_B batch rows of inputs (stored dtype)
    # m_ref  : (TB, L)       matching block of mask_nonzero
    # out_ref: (TB, D)       pooled outputs
    # sc_ref : (TB, L)       softmax attention scores
    x = x_ref[...]                                  # keep stored dtype (no full-tile upcast)
    w = w_ref[0, :].astype(x.dtype)                 # (D,)
    m = m_ref[...]                                  # (TB, L)

    # scores[b, l] = <x[b, l, :], w>  -- VPU multiply, f32 lane reduce. The
    # result needs L on lanes for the masked softmax below, so this layout is
    # already the one we want.
    s = jnp.sum((x * w).astype(jnp.float32), axis=-1)        # (TB, L) f32

    # masked_fill(mask_nonzero == 0, -inf)
    s = jnp.where(m == 0, -jnp.inf, s)

    # softmax over the sequence axis (f32).
    # TODO(synk): a fully-masked row yields NaN, same as the PyTorch reference.
    s_max = jnp.max(s, axis=-1, keepdims=True)               # (TB, 1)
    e = jnp.exp(s - s_max)                                   # (TB, L)
    denom = jnp.sum(e, axis=-1, keepdims=True)               # (TB, 1)
    # EUP approx reciprocal (otherwise-idle slot) + one Newton step for ~f32 parity.
    r = pl.reciprocal(denom, approx=True)
    r = r * (2.0 - denom * r)
    p = e * r                                                # (TB, L) f32

    # outputs[b, :] = p[b, :] @ x[b, :, :]  -- batched (1, L) x (L, D) matmul on
    # the MXU (free vex slot): p already has L on lanes for the LHS and x has
    # L on sublanes / D on lanes for the RHS, so no relayout is required.
    out3 = jnp.einsum("bql,bld->bqd",
                      p[:, None, :].astype(x.dtype), x,
                      preferred_element_type=jnp.float32)    # (TB, 1, D)

    out_ref[...] = out3[:, 0, :].astype(out_ref.dtype)
    sc_ref[...] = p.astype(sc_ref.dtype)


def _pick_tile_b(B, L, D, itemsize, *, min_steps=4, target_bytes=None):
    """Pick the batch tile size.

    * Keep at least ~`min_steps` grid steps whenever B allows it so that
      (a) the "parallel" batch axis has work to shard across v7x's two
      TensorCores and (b) BlockSpec double-buffering can overlap the x-tile
      DMA with compute of the previous tile.
    * Within that constraint, grow the tile toward `target_bytes` per x tile:
      conservative ~4 MiB on 64 MiB-VMEM parts (v7x, per-TC), ~8 MiB when
      128 MiB VMEM is reported (v5e/v6e) -- paired with an explicit
      vmem_limit_bytes in the caller.
    * The tile is either the whole batch or a multiple of 8 so the
      (TILE_B, L) / (TILE_B, D) blocks respect the (8, 128) sublane rule.
    """
    if target_bytes is None:
        try:
            vmem = pltpu.get_tpu_info().vmem_capacity_bytes
        except Exception:  # non-TPU tracing / interpret mode
            vmem = 64 << 20
        target_bytes = (8 << 20) if vmem >= (128 << 20) else (4 << 20)
    row_bytes = max(1, L * D * itemsize)
    cap_vmem = max(8, (target_bytes // row_bytes) // 8 * 8)
    cap_steps = max(8, (pl.cdiv(B, min_steps) + 7) // 8 * 8)
    tb = min(cap_vmem, cap_steps)
    if tb >= B:
        return B
    return int(tb)


def mask_attention(inputs, mask_nonzero, weight):
    """inputs: (B, L, D), mask_nonzero: (B, L), weight: (1, D).

    Returns (outputs, scores) with shapes (B, D) and (B, 1, L)."""
    B, L, D = inputs.shape
    tile_b = _pick_tile_b(B, L, D, inputs.dtype.itemsize)
    grid = (pl.cdiv(B, tile_b),)

    # Scoped-VMEM budget: double-buffered input/output tiles + small f32
    # temporaries + headroom, clamped so it fits every generation (v7x has
    # only 64 MiB of VMEM per TensorCore; v5e's default scoped limit is 16 MiB).
    x_tile = tile_b * L * D * inputs.dtype.itemsize
    small_tiles = (tile_b * L * mask_nonzero.dtype.itemsize
                   + tile_b * D * inputs.dtype.itemsize
                   + tile_b * L * 4
                   + D * weight.dtype.itemsize)
    f32_temps = 6 * tile_b * L * 4 + 2 * tile_b * D * 4
    vmem_limit = int(min(max(2 * (x_tile + small_tiles) + f32_temps + (2 << 20),
                             32 << 20),
                         56 << 20))

    cost = pl.CostEstimate(
        flops=4 * B * L * D,                       # scores + pooling contractions
        transcendentals=B * L,                     # exp
        bytes_accessed=(B * L * D * inputs.dtype.itemsize        # x read
                        + B * L * mask_nonzero.dtype.itemsize    # mask read
                        + D * weight.dtype.itemsize              # w read
                        + B * D * inputs.dtype.itemsize          # outputs write
                        + B * L * 4),                            # scores write
    )

    # TODO(synk): for production shapes where D or L is not a multiple of 128,
    # zero-pad D (inputs + weight) in the wrapper and slice after the call so
    # the (B, D)/(B, L) output stores stay lane-dense (vst, not vst.msk). At
    # the toy test sizes the call is pure overhead either way.
    out, scores = pl.pallas_call(
        _mask_attention_kernel,
        out_shape=(
            jax.ShapeDtypeStruct((B, D), inputs.dtype),
            jax.ShapeDtypeStruct((B, L), jnp.float32),
        ),
        grid=grid,
        in_specs=[
            pl.BlockSpec((1, D), lambda b: (0, 0)),              # weight (shared)
            pl.BlockSpec((tile_b, L, D), lambda b: (b, 0, 0)),   # inputs block
            pl.BlockSpec((tile_b, L), lambda b: (b, 0)),         # mask block
        ],
        out_specs=(
            pl.BlockSpec((tile_b, D), lambda b: (b, 0)),         # pooled outputs
            pl.BlockSpec((tile_b, L), lambda b: (b, 0)),         # scores
        ),
        compiler_params=pltpu.CompilerParams(
            dimension_semantics=("parallel",),                   # megacore on v7x
            vmem_limit_bytes=vmem_limit,
        ),
        cost_estimate=cost,
    )(weight, inputs, mask_nonzero)

    return out, scores.reshape(B, 1, L)


def _reference(inputs, mask_nonzero, weight):
    # Pure-JAX reference mirroring the PyTorch forward. Written with explicit
    # multiply+sum (no dot ops) so XLA's default reduced-precision f32 matmul
    # on TPU cannot perturb the reference values.
    scores = jnp.sum(inputs * weight[0][None, None, :], axis=-1)   # (B, L)
    scores = jnp.where(mask_nonzero == 0, -jnp.inf, scores)
    scores = jax.nn.softmax(scores, axis=-1)[:, None, :]           # (B, 1, L)
    outputs = jnp.sum(scores[:, 0, :, None] * inputs, axis=1)      # (B, D)
    return outputs, scores


if __name__ == "__main__":
    B, L, D = 2, 8, 32
    key = jax.random.PRNGKey(0)
    k_x, k_m, k_w = jax.random.split(key, 3)

    inputs = jax.random.normal(k_x, (B, L, D), dtype=jnp.float32)
    mask = (jax.random.uniform(k_m, (B, L)) > 0.3).astype(jnp.float32)
    mask = mask.at[:, 0].set(1.0)  # ensure every row has at least one valid slot

    # attention_layer = nn.Linear(D, 1, bias=False) -> weight shape (1, D)
    bound = 1.0 / (D ** 0.5)
    weight = jax.random.uniform(k_w, (1, D), minval=-bound, maxval=bound,
                                dtype=jnp.float32)

    outputs, scores = mask_attention(inputs, mask, weight)
    jax.block_until_ready((outputs, scores))

    ref_out, ref_scores = _reference(inputs, mask, weight)
    assert outputs.shape == (B, D) and scores.shape == (B, 1, L)
    # Scores are computed with exact f32 VPU math in both paths -> tight check.
    assert jnp.allclose(scores, ref_scores, atol=1e-4, rtol=1e-4)
    # Pooled outputs go through the MXU; the f32 matmul may be decomposed into
    # bf16 passes depending on generation/compiler defaults, so allow ~5e-3.
    assert jnp.allclose(outputs, ref_out, atol=5e-3, rtol=5e-3)

    print("KERNEL_OK")
</pallas_src>

<mosaic_0001>
module attributes {stable_mosaic.version = 11 : i64} {
  func.func @_mask_attention_kernel(%arg0: i32, %arg1: memref<1x32xf32, #tpu.memory_space<vmem>>, %arg2: memref<2x8x32xf32, #tpu.memory_space<vmem>>, %arg3: memref<2x8xf32, #tpu.memory_space<vmem>>, %arg4: memref<2x32xf32, #tpu.memory_space<vmem>>, %arg5: memref<2x8xf32, #tpu.memory_space<vmem>>) attributes {dimension_semantics = [#tpu.dimension_semantics<parallel>], iteration_bounds = array<i64: 1>, scalar_prefetch = 0 : i64, scratch_operands = 0 : i64, tpu.core_type = #tpu.core_type<tc>, window_params = [{pipeline_mode = #tpu.pipeline_mode<synchronous>, transform_indices = @transform_0, window_bounds = array<i64: 1, 32>}, {transform_indices = @transform_1, window_bounds = array<i64: 2, 8, 32>}, {transform_indices = @transform_2, window_bounds = array<i64: 2, 8>}, {transform_indices = @transform_3, window_bounds = array<i64: 2, 32>}, {transform_indices = @transform_4, window_bounds = array<i64: 2, 8>}]} {
    %c0 = arith.constant 0 : index
    %c0_0 = arith.constant 0 : index
    %c0_1 = arith.constant 0 : index
    %0 = vector.load %arg2[%c0, %c0_0, %c0_1] : memref<2x8x32xf32, #tpu.memory_space<vmem>>, vector<2x8x32xf32>
    %c0_2 = arith.constant 0 : index
    %c0_3 = arith.constant 0 : index
    %1 = vector.load %arg1[%c0_2, %c0_3] : memref<1x32xf32, #tpu.memory_space<vmem>>, vector<1x32xf32>
    %2 = vector.shape_cast %1 : vector<1x32xf32> to vector<32xf32>
    %c0_4 = arith.constant 0 : index
    %c0_5 = arith.constant 0 : index
    %3 = vector.load %arg3[%c0_4, %c0_5] : memref<2x8xf32, #tpu.memory_space<vmem>>, vector<2x8xf32>
    %4 = vector.shape_cast %2 : vector<32xf32> to vector<1x1x32xf32>
    %5 = vector.broadcast %4 : vector<1x1x32xf32> to vector<2x8x32xf32>
    %6 = arith.mulf %0, %5 : vector<2x8x32xf32>
    %cst = arith.constant dense<0.000000e+00> : vector<2x8xf32>
    %7 = vector.multi_reduction <add>, %6, %cst [2] : vector<2x8x32xf32> to vector<2x8xf32>
    %cst_6 = arith.constant 0.000000e+00 : f32
    %8 = vector.broadcast %cst_6 : f32 to vector<2x8xf32>
    %9 = arith.cmpf oeq, %3, %8 : vector<2x8xf32>
    %cst_7 = arith.constant 0xFF800000 : f32
    %10 = vector.broadcast %cst_7 : f32 to vector<2x8xf32>
    %11 = arith.select %9, %10, %7 : vector<2x8xi1>, vector<2x8xf32>
    %cst_8 = arith.constant dense<0xFF800000> : vector<2xf32>
    %12 = vector.multi_reduction <maximumf>, %11, %cst_8 [1] : vector<2x8xf32> to vector<2xf32>
    %13 = vector.shape_cast %12 : vector<2xf32> to vector<2x1xf32>
    %14 = vector.broadcast %13 : vector<2x1xf32> to vector<2x8xf32>
    %15 = arith.subf %11, %14 : vector<2x8xf32>
    %16 = math.exp %15 : vector<2x8xf32>
    %cst_9 = arith.constant dense<0.000000e+00> : vector<2xf32>
    %17 = vector.multi_reduction <add>, %16, %cst_9 [1] : vector<2x8xf32> to vector<2xf32>
    %18 = vector.shape_cast %17 : vector<2xf32> to vector<2x1xf32>
    %19 = tpu.reciprocal %18 {approx = true} : vector<2x1xf32> -> vector<2x1xf32>
    %20 = arith.mulf %18, %19 : vector<2x1xf32>
    %cst_10 = arith.constant 2.000000e+00 : f32
    %21 = vector.broadcast %cst_10 : f32 to vector<2x1xf32>
    %22 = arith.subf %21, %20 : vector<2x1xf32>
    %23 = arith.mulf %19, %22 : vector<2x1xf32>
    %24 = vector.broadcast %23 : vector<2x1xf32> to vector<2x8xf32>
    %25 = arith.mulf %16, %24 : vector<2x8xf32>
    %26 = vector.shape_cast %25 : vector<2x8xf32> to vector<2x1x8xf32>
    "tpu.trace_start"() <{level = 10 : i32, message = "bql,bld->bqd"}> : () -> ()
    %cst_11 = arith.constant dense<0.000000e+00> : vector<2x1x32xf32>
    %27 = tpu.matmul %26, %0, %cst_11 {dimension_numbers = #tpu.dot_dimension_numbers<[2], [1], [1], [2], [0, 0, 0, 1, 1, 2], [0], [0]>} : vector<2x1x8xf32>, vector<2x8x32xf32>, vector<2x1x32xf32> -> vector<2x1x32xf32>
    "tpu.trace_stop"() : () -> ()
    %28 = vector.shape_cast %27 : vector<2x1x32xf32> to vector<2x32xf32>
    %c0_12 = arith.constant 0 : index
    %c0_13 = arith.constant 0 : index
    %29 = vector.load %arg4[%c0_12, %c0_13] : memref<2x32xf32, #tpu.memory_space<vmem>>, vector<2x32xf32>
    tpu.vector_store %arg4[%c0_12, %c0_13], %28 {strides = array<i32>} : memref<2x32xf32, #tpu.memory_space<vmem>>, vector<2x32xf32>,
    %c0_14 = arith.constant 0 : index
    %c0_15 = arith.constant 0 : index
    %30 = vector.load %arg5[%c0_14, %c0_15] : memref<2x8xf32, #tpu.memory_space<vmem>>, vector<2x8xf32>
    tpu.vector_store %arg5[%c0_14, %c0_15], %25 {strides = array<i32>} : memref<2x8xf32, #tpu.memory_space<vmem>>, vector<2x8xf32>,
    return
  }
  func.func @transform_0(%arg0: i32) -> (i32, i32) {
    %c0_i32 = arith.constant 0 : i32
    %c0_i32_0 = arith.constant 0 : i32
    %c0_i32_1 = arith.constant 0 : i32
    return %c0_i32, %c0_i32_0 : i32, i32
  }
  func.func @transform_1(%arg0: i32) -> (i32, i32, i32) {
    %c0_i32 = arith.constant 0 : i32
    %c0_i32_0 = arith.constant 0 : i32
    %c0_i32_1 = arith.constant 0 : i32
    return %arg0, %c0_i32, %c0_i32_0 : i32, i32, i32
  }
  func.func @transform_2(%arg0: i32) -> (i32, i32) {
    %c0_i32 = arith.constant 0 : i32
    %c0_i32_0 = arith.constant 0 : i32
    return %arg0, %c0_i32 : i32, i32
  }
  func.func @transform_3(%arg0: i32) -> (i32, i32) {
    %c0_i32 = arith.constant 0 : i32
    %c0_i32_0 = arith.constant 0 : i32
    return %arg0, %c0_i32 : i32, i32
  }
  func.func @transform_4(%arg0: i32) -> (i32, i32) {
    %c0_i32 = arith.constant 0 : i32
    %c0_i32_0 = arith.constant 0 : i32
    return %arg0, %c0_i32 : i32, i32
  }
}

</mosaic_0001>

<bundles_post_ra>
// kernel: tpu_custom_call.1
= control target key start
LH: loop header
LB: loop body
LE: loop exit
PB: predicated region body
PF: predicated region fallthrough
CT: control target
= control target key end

     0   :  { %10 = vsyncpa [#allocation3], 0  ;;  %s386_s0 = inlined_call_operand.hbm [shape: f32[1,32], index: 0, kind: input, shape index: {}]   ;;  %s387_s1 = inlined_call_operand.hbm [shape: f32[2,8,32], index: 1, kind: input, shape index: {}]   ;;  %s388_s2 = inlined_call_operand.hbm [shape: f32[2,8], index: 2, kind: input, shape index: {}]   ;;  %s389_s3 = inlined_call_operand.hbm [shape: f32[2,32], index: 3, kind: output, shape index: {0}]   ;;  %s390_s4 = inlined_call_operand.hbm [shape: f32[2,8], index: 4, kind: output, shape index: {1}]  }
   0x1   :  { %11 = vsyncpa [#allocation6], 0 }
   0x2   :  { %12 = vsyncpa [#allocation4], 0  ;;  %s29_s17 = sshll.u32 %s387_s1, 4  ;;  %s30_s17 = int_to_ptr.hbm [resolvable:$true] %s29_s17 }
   0x3   :  { %13 = vsyncpa [#allocation10], 0  ;;  %s334_s18 = smov [#allocation5]   ;;  %s19_s22 = sshll.u32 %s386_s0, 4  ;;  %s20_s22 = int_to_ptr.hbm [resolvable:$true] %s19_s22 }
   0x4   :  { %s31_s19 = sshll.u32 %s334_s18, 4  ;;  %s335_s23 = smov 128   ;;  %s32_s19 = int_to_ptr.vmem [resolvable:$true] %s31_s19 }
   0x5   :  { %s336_s24 = smov 8   ;;  %s337_s25 = smov [#allocation2]  }
   0x6   :  { %37 = dma.hbm_to_vmem [thread:$0]  %s30_s17, 256, %s32_s19, [#allocation6], %s335_s23, %s335_s23, %s336_s24  }
   0x7   :  { %s21_s26 = sshll.u32 %s337_s25, 4  ;;  %s43_s29 = sshll.u32 %s388_s2, 4  ;;  %s22_s26 = int_to_ptr.vmem [resolvable:$true] %s21_s26  ;;  %s44_s29 = int_to_ptr.hbm [resolvable:$true] %s43_s29 }
   0x8   :  { %24 = dma.hbm_to_vmem [thread:$0]  %s20_s22, 16, %s22_s26, [#allocation3]  }
   0x9   :  { %s338_s1 = smov [#allocation7]  }
   0xa   :  { %s45_s30 = sshll.u32 %s338_s1, 4  ;;  %s46_s30 = int_to_ptr.vmem [resolvable:$true] %s45_s30 }
   0xb   :  { %48 = dma.hbm_to_vmem [thread:$0]  %s44_s29, 32, %s46_s30, [#allocation6]  }
   0xc   :  { %326 = dma.done.wait [#allocation3], 16  }
   0xd   :  { %327 = vsyncadd [#allocation3], 4294967280 }
   0xe   :  { %328 = dma.done.wait [#allocation6], 288  }
   0xf   :  { %329 = vsyncadd [#allocation6], 4294967008  ;;  %v61_v0 = vld [vmem:[#allocation5] sm:$0xff]  ;;  %v201_v1 = vld [vmem:[#allocation2] ss:$0 sm:$0xff]  ;;  %vm70_vm0 = vcmask 261120   ;;  %v80_v8 = vlaneseq }
  0x10   :  { %v62_v2 = vld [vmem:[#allocation5 + $0x8] sm:$0xff]  ;;  %123 = vmatpush.msra.mxu0 %v61_v0  ;;  %v68_v3 = vmul.f32 %v201_v1, %v61_v0  ;;  %v64_v10 = vld [vmem:[#allocation7] sm:$0x3]  ;;  %vm84_vm1 = vcmask 1041409   ;;  %vm88_vm3 = vcmask 58368   ;;  %vm105_vm4 = vcmask 64512  }
  0x11   :  { %145 = vmatpush.msra.mxu1 %v62_v2  ;;  %v69_v5 = vmul.f32 %v201_v1, %v62_v2  ;;  %v81_v9 = vand.u32 127, %v80_v8  ;;  %vm77_vm2 = vcmp.eq.f32.partialorder %v64_v10, 0.0  ;;  %s339_s0 = smov [#allocation9]   ;;  %s176_s7 = sshll.u32 %s390_s4, 4  ;;  %vm155_vm5 = vcmask 254976   ;;  %s177_s7 = int_to_ptr.hbm [resolvable:$true] %s176_s7 }
  0x12   :  { %v71_v4 = vsel %vm70_vm0, %v68_v3, 0.0  ;;  %s174_s2 = sshll.u32 %s339_s0, 4  ;;  %s340_s8 = smov [#allocation8]   ;;  %s175_s2 = int_to_ptr.vmem [resolvable:$true] %s174_s2 }
  0x13   :  { %72 = vadd.xlane.f32.xlu0 %v71_v4  ;;  %v74_v6 = vsel %vm70_vm0, %v69_v5, 0.0  ;;  %s163_s9 = sshll.u32 %s340_s8, 4  ;;  %s165_s12 = sshll.u32 %s389_s3, 4  ;;  %s164_s9 = int_to_ptr.vmem [resolvable:$true] %s163_s9  ;;  %s166_s12 = int_to_ptr.hbm [resolvable:$true] %s165_s12 }
  0x1b   :  { %75 = vadd.xlane.f32.xlu0 %v74_v6 }
  0x86   :  { %v73_v7 = vpop.xlane.xlu0 %72 }
  0x87   :  { %v82_v12 = vperm.slane %v73_v7, %v81_v9 }
  0x8e   :  { %v76_v11 = vpop.xlane.xlu0 %75 }
  0x8f   :  { %v83_v13 = vperm.slane %v76_v11, %v81_v9 }
  0x91   :  { %v85_v14 = vsel %vm84_vm1, %v83_v13, %v82_v12 }
  0x92   :  { %v87_v15 = vsel %vm77_vm2, -inf, %v85_v14 }
  0x93   :  { %v89_v16 = vsel %vm88_vm3, %v87_v15, -inf }
  0x94   :  { %90 = vmax.xlane.f32.xlu1 %v89_v16 }
 0x107   :  { %v91_v17 = vpop.xlane.xlu1 %90 }
 0x108   :  { %v92_v18 = vsub.f32 %v87_v15, %v91_v17 }
 0x10a   :  { %v93_v19 = vmul.f32 1.442695, %v92_v18 }
 0x10c   :  { %202 = vpow2.f32 %v93_v19 }
 0x112   :  { %v203_v20 = vpop.eup %202 }
 0x113   :  { %v95_v21 = vsel %vm88_vm3, %v203_v20, 0.0 }
 0x114   :  { %96 = vadd.xlane.f32.xlu1 %v95_v21 }
 0x187   :  { %v97_v22 = vpop.xlane.xlu1 %96 }
 0x188   :  { %204 = vrcp.f32 %v97_v22 }
 0x18e   :  { %v205_v23 = vpop.eup %204 }
 0x18f   :  { %v99_v24 = vmul.f32 %v205_v23, %v97_v22 }
 0x191   :  { %v100_v25 = vsub.f32 2.0, %v99_v24 }
 0x193   :  { %v101_v26 = vmul.f32 %v205_v23, %v100_v25 }
 0x195   :  { %v102_v27 = vmul.f32 %v203_v20, %v101_v26 }
 0x197   :  { %192 = vmatmul.msk.f32.vlgmr.msra.gmra.mxu0 %vm105_vm4, %v102_v27  ;;  %157 = vst.msk [vmem:[#allocation9] sm:$0x3] %vm88_vm3, %v102_v27  ;;  %v104_v28 = vrot.slane %v102_v27, 1 }
 0x198   :  { %179 = dma.vmem_to_hbm [thread:$0]  %s175_s2, 32, %s177_s7, [#allocation10]  }
 0x199   :  { %193 = vmatmul.msk.f32.vlgmr.msra.gmra.mxu1 %vm105_vm4, %v104_v28 }
 0x214   :  { %v125_v31 = vpop.f32.mrf.mxu0 }
 0x216   :  { %v147_v29 = vpop.f32.mrf.mxu1 }
 0x217   :  { %v152_v30 = vrot.slane %v147_v29, 7 }
 0x219   :  { %v153_v32 = vsel %vm84_vm1, %v152_v30, %v125_v31 }
 0x21a   :  { %156 = vst.msk [vmem:[#allocation8] sm:$0x3] %vm155_vm5, %v153_v32 }
 0x21b   :  { %168 = dma.vmem_to_hbm [thread:$0]  %s164_s9, 32, %s166_s12, [#allocation4]  }
 0x21c   :  { %330 = dma.done.wait [#allocation4], 32  }
 0x21d   :  { %331 = vsyncadd [#allocation4], 4294967264 }
 0x21e   :  { %332 = dma.done.wait [#allocation10], 32  }
 0x21f   :  { %333 = vsyncadd [#allocation10], 4294967264 }
 0x220   :  { %188 = vsyncpa [#allocation3], 1 }
 0x221   :  { %189 = vsyncpa [#allocation6], 1 }
 0x222   :  { %190 = vsyncpa [#allocation4], 1 }
 0x223   :  { %191 = vsyncpa [#allocation10], 1 }

</bundles_post_ra>
